<compile_context>
chip_gen: v7x
topology: tpu7x:2x2x1
jax: 0.10.0
libtpu: 0.0.40
codegen_flags: <defaults>
</compile_context>

<pallas_src>
import jax
import jax.numpy as jnp
from jax.experimental import pallas as pl
from jax.experimental.pallas import tpu as pltpu


def _moving_avg_kernel(w_ref, x_ref, o_ref):
    # w_ref: (L_out, L) f32 averaging weights (replicate-pad folded into edge columns)
    # x_ref: (TB, L, TC) input tile; o_ref: (TB, L_out, TC) output tile.
    w = w_ref[...]
    tb = x_ref.shape[0]
    for b in range(tb):  # TB is small & static -> unrolled
        xb = x_ref[b].astype(jnp.float32)                        # (L, TC)
        ob = jnp.dot(w, xb, preferred_element_type=jnp.float32)  # (L_out, TC) on the MXU
        o_ref[b] = ob.astype(o_ref.dtype)


def _pick_channel_tile(c):
    # Tile channels only when C is a large multiple of 128; otherwise the block must
    # cover the full channel dim (Pallas (8,128) block rule).
    if c % 128 != 0 or c <= 512:
        return c
    for tc in (512, 384, 256, 128):
        if c % tc == 0:
            return tc
    return c


def _pick_batch_tile(b, l, l_out, tc, itemsize, n_channel_blocks):
    # Largest batch tile whose (input + output) block fits a conservative VMEM budget
    # (the pipeline double-buffers it), while keeping >= 2 grid steps when possible so
    # the parallel grid axis can shard across v7x's two TensorCores.
    budget = 6 * 1024 * 1024
    per_row = (l + l_out) * tc * max(int(itemsize), 4)
    tb = int(max(1, min(b, budget // max(per_row, 1), 16)))
    while b % tb != 0:
        tb -= 1
    if b >= 2 and n_channel_blocks * (b // tb) < 2:
        tb2 = b // 2
        while b % tb2 != 0:
            tb2 -= 1
        tb = tb2
    return tb


def moving_avg(x, kernel_size, stride):
    """x: [B, L, C] float array. Returns [B, L_out, C] (same semantics as the module)."""
    b, l, c = x.shape
    pad = (kernel_size - 1) // 2
    l_pad = l + 2 * pad
    l_out = (l_pad - kernel_size) // stride + 1

    # ---- Banded averaging matrix with replicate-pad folded into the edge columns ----
    # Window for output o covers unpadded indices [o*stride - pad, o*stride - pad + K - 1];
    # out-of-range positions are clamped to index 0 / L-1 (replicate pad), which becomes
    # extra weight on the first / last column.
    o_idx = jnp.arange(l_out, dtype=jnp.int32)[:, None]       # (L_out, 1)
    j_idx = jnp.arange(l, dtype=jnp.int32)[None, :]           # (1, L)
    start = o_idx * stride - pad                               # (L_out, 1)
    band = ((j_idx >= start) & (j_idx <= start + (kernel_size - 1))).astype(jnp.float32)
    n_front = jnp.maximum(0, -start).astype(jnp.float32)[:, 0]
    n_end = jnp.maximum(0, start + kernel_size - l).astype(jnp.float32)[:, 0]
    w = band.at[:, 0].add(n_front).at[:, l - 1].add(n_end)
    w = w * jnp.float32(1.0 / kernel_size)                     # (L_out, L)

    # ---- Tiling ----
    tc = _pick_channel_tile(c)
    nc = c // tc
    tb = _pick_batch_tile(b, l, l_out, tc, x.dtype.itemsize, nc)
    nb = b // tb

    itemsize = int(x.dtype.itemsize)
    in_bytes = tb * l * tc * itemsize
    out_bytes = tb * l_out * tc * itemsize
    w_bytes = l_out * l * 4
    # TODO(synk): for very long sequences (L_out*L too large for VMEM) the weight matrix
    # should be tiled over time with a halo instead of held whole.
    vmem_limit = int(min(max(2 * (in_bytes + out_bytes + w_bytes) + (8 << 20), 16 << 20),
                         48 << 20))

    return pl.pallas_call(
        _moving_avg_kernel,
        out_shape=jax.ShapeDtypeStruct((b, l_out, c), x.dtype),
        grid_spec=pltpu.PrefetchScalarGridSpec(
            num_scalar_prefetch=0,
            grid=(nb, nc),
            in_specs=[
                pl.BlockSpec((l_out, l), lambda i, j: (0, 0)),     # W: same block every step
                pl.BlockSpec((tb, l, tc), lambda i, j: (i, 0, j)),
            ],
            out_specs=pl.BlockSpec((tb, l_out, tc), lambda i, j: (i, 0, j)),
        ),
        compiler_params=pltpu.CompilerParams(
            dimension_semantics=("parallel", "parallel"),
            vmem_limit_bytes=vmem_limit,
        ),
    )(w, x)


def _reference(x, kernel_size, stride):
    # Pure-JAX reference: replicate-pad + sliding mean over time.
    pad = (kernel_size - 1) // 2
    front = jnp.repeat(x[:, 0:1, :], pad, axis=1)
    end = jnp.repeat(x[:, -1:, :], pad, axis=1)
    xp = jnp.concatenate([front, x, end], axis=1)
    l_out = (x.shape[1] + 2 * pad - kernel_size) // stride + 1
    return jnp.stack(
        [xp[:, t * stride: t * stride + kernel_size, :].mean(axis=1) for t in range(l_out)],
        axis=1,
    )


if __name__ == "__main__":
    # Small shapes consistent with the time-series forward: batch=2, seq_len=16, channels=8.
    B, L, C = 2, 16, 8
    key = jax.random.PRNGKey(0)
    x = jax.random.normal(key, (B, L, C), dtype=jnp.float32)

    # (kernel_size, stride): default DLinear-style, DLinear-typical K=25, and a stride>1
    # + even-kernel case (per the correctness-review request to exercise stride != 1).
    configs = [(5, 1), (25, 1), (4, 2)]
    for ks, st in configs:
        out = jax.block_until_ready(moving_avg(x, ks, st))
        ref = _reference(x, ks, st)
        assert out.shape == ref.shape, (ks, st, out.shape, ref.shape)
        assert jnp.allclose(out, ref, atol=1e-5, rtol=1e-5), f"mismatch ks={ks} stride={st}"

    print("KERNEL_OK")
</pallas_src>

<mosaic_0001>
module attributes {stable_mosaic.version = 11 : i64} {
  func.func @_moving_avg_kernel(%arg0: i32, %arg1: i32, %arg2: memref<16x16xf32, #tpu.memory_space<vmem>>, %arg3: memref<1x16x8xf32, #tpu.memory_space<vmem>>, %arg4: memref<1x16x8xf32, #tpu.memory_space<vmem>>) attributes {dimension_semantics = [#tpu.dimension_semantics<parallel>, #tpu.dimension_semantics<parallel>], iteration_bounds = array<i64: 2, 1>, scalar_prefetch = 0 : i64, scratch_operands = 0 : i64, tpu.core_type = #tpu.core_type<tc>, window_params = [{pipeline_mode = #tpu.pipeline_mode<synchronous>, transform_indices = @transform_0, window_bounds = array<i64: 16, 16>}, {transform_indices = @transform_1, window_bounds = array<i64: 1, 16, 8>}, {transform_indices = @transform_2, window_bounds = array<i64: 1, 16, 8>}]} {
    %c0 = arith.constant 0 : index
    %c0_0 = arith.constant 0 : index
    %0 = vector.load %arg2[%c0, %c0_0] : memref<16x16xf32, #tpu.memory_space<vmem>>, vector<16x16xf32>
    %c0_1 = arith.constant 0 : index
    %c0_2 = arith.constant 0 : index
    %c0_3 = arith.constant 0 : index
    %1 = vector.load %arg3[%c0_1, %c0_2, %c0_3] : memref<1x16x8xf32, #tpu.memory_space<vmem>>, vector<1x16x8xf32>
    %2 = vector.shape_cast %1 : vector<1x16x8xf32> to vector<16x8xf32>
    %cst = arith.constant dense<0.000000e+00> : vector<16x8xf32>
    %3 = tpu.matmul %0, %2, %cst {dimension_numbers = #tpu.dot_dimension_numbers<[1], [0], [0], [1], [0, 0, 1, 1], [], []>} : vector<16x16xf32>, vector<16x8xf32>, vector<16x8xf32> -> vector<16x8xf32>
    %c0_4 = arith.constant 0 : index
    %c0_5 = arith.constant 0 : index
    %c0_6 = arith.constant 0 : index
    %4 = vector.load %arg4[%c0_4, %c0_5, %c0_6] : memref<1x16x8xf32, #tpu.memory_space<vmem>>, vector<1x16x8xf32>
    %5 = vector.shape_cast %4 : vector<1x16x8xf32> to vector<16x8xf32>
    %6 = vector.shape_cast %3 : vector<16x8xf32> to vector<1x16x8xf32>
    tpu.vector_store %arg4[%c0_4, %c0_5, %c0_6], %6 {strides = array<i32>} : memref<1x16x8xf32, #tpu.memory_space<vmem>>, vector<1x16x8xf32>,
    return
  }
  func.func @transform_0(%arg0: i32, %arg1: i32) -> (i32, i32) {
    %c0_i32 = arith.constant 0 : i32
    %c0_i32_0 = arith.constant 0 : i32
    %c0_i32_1 = arith.constant 0 : i32
    return %c0_i32, %c0_i32_0 : i32, i32
  }
  func.func @transform_1(%arg0: i32, %arg1: i32) -> (i32, i32, i32) {
    %c0_i32 = arith.constant 0 : i32
    %c0_i32_0 = arith.constant 0 : i32
    return %arg0, %c0_i32, %arg1 : i32, i32, i32
  }
  func.func @transform_2(%arg0: i32, %arg1: i32) -> (i32, i32, i32) {
    %c0_i32 = arith.constant 0 : i32
    %c0_i32_0 = arith.constant 0 : i32
    return %arg0, %c0_i32, %arg1 : i32, i32, i32
  }
}

</mosaic_0001>

<bundles_post_ra>
// kernel: tpu_custom_call.1
= control target key start
LH: loop header
LB: loop body
LE: loop exit
PB: predicated region body
PF: predicated region fallthrough
CT: control target
= control target key end

     0   :  { %s440_s9 = smov 0   ;;  %s442_s10 = smov 0   ;;  %s476_s0 = inlined_call_operand.vmem [shape: f32[16,16], index: 0, kind: input, shape index: {}]   ;;  %s477_s1 = inlined_call_operand.vmem [shape: f32[2,16,8], index: 1, kind: input, shape index: {}]   ;;  %s478_s2 = inlined_call_operand.vmem [shape: f32[2,16,8], index: 2, kind: output, shape index: {}]  }
   0x1   :  { %s444_s11 = smov 0  }
   0x2 LB: > { %s24_s12 = sadd.s32 1, %s419_s10  ;;  %p351_p0 = scmp.ge.s32.totalorder %s423_s11, 1  ;;  %s423_s11 = sphi %s444_s11, %s12_s11   ;;  %s419_s10 = sphi %s442_s10, %s480_s10   ;;  %s415_s9 = sphi %s440_s9, %s479_s9  }
   0x3   : > { %p26_p1 = scmp.ge.s32.totalorder %s24_s12, 2  ;;  %p131_p2 = scmp.lt.s32.totalorder %s423_s11, 3 }
   0x5   : > { %s482_s12 = smov (%p26_p1, %s24_s12), 0  ;;  %p132_p3 = pnand %p351_p0, %p131_p2 }
   0x6   : > { %p159_p4 = scmp.lt.s32.totalorder (!%p132_p3), %s415_s9, 1  ;;  %v175_v0 = vld [vmem:[%s476_s0] sm:$0xff] (!%p132_p3)  ;;  %vm179_vm0 = vcmask (!%p132_p3), 130048   ;;  %v176_v4 = vld [vmem:[%s476_s0 + $0x8] sm:$0xff] (!%p132_p3)  ;;  %vm261_vm1 = vcmask (!%p132_p3), 64512  }
   0x7   : > { %135 = sbr.rel (%p132_p3) target bundleno = 238 (0xee), region = 28  ;;  %370 = vmatprep.mubr.msk.f32.mxu0 (!%p132_p3), %vm179_vm0, %v175_v0 }
   0xe   : > { %s484_s9 = smov (!%p159_p4, %s415_s9), 1 }
   0xf   : > { %s360_s15 = sshll.u32 %s484_s9, 4 }
  0x10   : > { %s166_s18 = scalar_lea.vmem %s477_s1, %s360_s15  ;;  %s174_s23 = scalar_lea.vmem %s478_s2, %s360_s15 }
  0x11   : > { %v177_v1 = vld [vmem:[%s166_s18] sm:$0xff]  ;;  %v178_v2 = vld [vmem:[%s166_s18 + $0x8] sm:$0xff] }
  0x12   : > { %v373_v3 = vpack.c.bf16 %v178_v2, %v177_v1 }
  0x14   : > { %374 = vmatprep.subr.bf16.mxu0 %v373_v3 }
  0x15   : > { %376 = vmatpush3.bf16.msra.mxu0 %v373_v3 }
  0x18   : > { %371 = vmatmul.mubr.msk.f32.vlgmr.msra.gmra.mrb[0].mxu0 %vm179_vm0, %v176_v4 }
  0xeb   : > { %v372_v5 = vpop.f32.mrb[0].mxu0 }
  0xec   : > { %263 = vst.msk [vmem:[%s174_s23 + $0x8] sm:$0xff] %vm261_vm1, %v372_v5  ;;  %v252_v6 = vpop.f32.mrb[1].mxu0 }
  0xed   : > { %262 = vst.msk [vmem:[%s174_s23] sm:$0xff] %vm261_vm1, %v252_v6 }
  0xee PF: > { %s12_s11 = sadd.s32 1, %s423_s11   ;;  %s479_s9 = smov %s419_s10 }
  0xef   : > { %p9_p5 = scmp.ge.s32.totalorder %s12_s11, 4   ;;  %s480_s10 = smov %s482_s12 }
  0xf1   :  { %11 = sbr.rel (!%p9_p5) target bundleno = 2 (0x2), region = 58 }

</bundles_post_ra>
